<compile_context>
chip_gen: v7x
topology: tpu7x:2x2x1
jax: 0.10.0
libtpu: 0.0.40
codegen_flags: <defaults>
</compile_context>

<pallas_src>
import jax
import jax.numpy as jnp
from jax.experimental import pallas as pl
from jax.experimental.pallas import tpu as pltpu


# ----------------------------------------------------------------------------
# Pallas kernels
# ----------------------------------------------------------------------------

def _bert_enc_kernel(emb_ref, w_enc_ref, hid_ref):
    # emb_ref: (1, S, Hb) bf16   w_enc: (Hb, Hb) bf16   hid: (1, S, Hb) bf16
    x = emb_ref[0]                                              # [S, Hb]
    h = jnp.tanh(jnp.dot(x, w_enc_ref[...],
                         preferred_element_type=jnp.float32))   # f32 accumulate
    hid_ref[0] = h.astype(hid_ref.dtype)


def _pooler_kernel(cls_ref, w_ref, b_ref, out_ref):
    # cls: (B, Hb) bf16   w: (Hb, Hb) bf16   b: (1, Hb) f32   out: (B, Hb) f32
    out_ref[...] = jnp.tanh(
        jnp.dot(cls_ref[...], w_ref[...], preferred_element_type=jnp.float32)
        + b_ref[...])


def _fused_word_graph_pool_kernel(oh_ref, x_ref, wd_ref, bd_ref,
                                  span_ref, kpm_ref, am_ref,
                                  wq_ref, wk_ref, wv_ref, wo_ref,
                                  out_ref):
    f32 = jnp.float32
    bf16 = jnp.bfloat16

    # ---- subtoken -> word mapback + dense projection (map_dense) ----------
    oh = oh_ref[0]                                              # [Lw, Lb] bf16 0/1
    x = x_ref[0]                                                # [Lb, Hb] bf16
    proj = jnp.dot(x, wd_ref[...],
                   preferred_element_type=f32) + bd_ref[...]    # [Lb, H] f32
    word = jnp.dot(oh, proj.astype(bf16),
                   preferred_element_type=f32)                  # [Lw, H] f32
    wnt = jnp.sum(oh.astype(f32), axis=-1, keepdims=True)       # [Lw, 1]
    wnt = jnp.where(wnt == 0.0, 1.0, wnt)                       # masked_fill(0 -> 1)
    word = word * pl.reciprocal(wnt, approx=True)               # bert_word

    # ---- masked self-attention averaged over N span masks (graph encoder) --
    # TODO(synk): H_TransformerEncoder internals are unspecified; stand-in is
    # a single residual masked self-attention layer averaged over the spans.
    h_dim = word.shape[-1]
    scale = 1.0 / (float(h_dim) ** 0.5)
    xw = word.astype(bf16)
    q = jnp.dot(xw, wq_ref[...], preferred_element_type=f32)
    k = jnp.dot(xw, wk_ref[...], preferred_element_type=f32)
    v = jnp.dot(xw, wv_ref[...], preferred_element_type=f32)

    pad = kpm_ref[0]                                            # [1, Lw], 1.0 = pad
    key_bias = pad * (-1e9)
    # Span-invariant logits, hoisted out of the per-span loop; dot_general
    # contracts the last dims so K is consumed transposed without an XLU copy.
    s_base = jax.lax.dot_general(
        q.astype(bf16), k.astype(bf16),
        dimension_numbers=(((1,), (1,)), ((), ())),
        preferred_element_type=f32) * scale + key_bias          # [Lw, Lw]

    span = span_ref[...]                                        # [N, 1, Lw, Lw] int8
    vb = v.astype(bf16)
    n_spans = span.shape[0]
    acc = jnp.zeros_like(word)
    for n in range(n_spans):                                    # static unroll, N small
        m = span[n, 0]                                          # [Lw, Lw] int8
        s = s_base + jnp.where(m > 0, 0.0, -1e9)
        s = s - jnp.max(s, axis=-1, keepdims=True)
        e = jnp.exp(s)
        p = e * pl.reciprocal(jnp.sum(e, axis=-1, keepdims=True), approx=True)
        acc = acc + jnp.dot(p.astype(bf16), vb, preferred_element_type=f32)
    acc = acc * (1.0 / float(n_spans))
    graph = word + jnp.dot(acc.astype(bf16), wo_ref[...],
                           preferred_element_type=f32)          # [Lw, H]
    # TODO(synk): fully padded query rows get a uniform-attention output; the
    # aspect-masked pooling below never reads those rows.

    # ---- aspect-masked mean pooling of bert_word + graph_out ---------------
    am = am_ref[0]                                              # [1, Lw] f32
    asp_wn = jnp.sum(am, axis=-1, keepdims=True)                # [1, 1]
    asp_wn = jnp.where(asp_wn == 0.0, 1.0, asp_wn)              # zero-mask guard
    pooled = jnp.dot(am, word + graph, preferred_element_type=f32)   # [1, H]
    out_ref[0] = pooled * pl.reciprocal(asp_wn, approx=True)


# ----------------------------------------------------------------------------
# pallas_call wrappers
# ----------------------------------------------------------------------------

def bert_encoder_pallas(emb_bf16, w_enc_bf16):
    B, S, Hb = emb_bf16.shape
    return pl.pallas_call(
        _bert_enc_kernel,
        out_shape=jax.ShapeDtypeStruct((B, S, Hb), jnp.bfloat16),
        grid=(B,),
        in_specs=[pl.BlockSpec((1, S, Hb), lambda b: (b, 0, 0)),
                  pl.BlockSpec((Hb, Hb), lambda b: (0, 0))],
        out_specs=pl.BlockSpec((1, S, Hb), lambda b: (b, 0, 0)),
        compiler_params=pltpu.CompilerParams(
            dimension_semantics=("parallel",)),
    )(emb_bf16, w_enc_bf16)


def bert_pooler_pallas(cls_bf16, w_pool_bf16, b_pool):
    # Batched over all B rows in one invocation (no per-batch grid): a 1-row
    # matmul per grid step wastes the MXU and keeps w_pool resident per step.
    B, Hb = cls_bf16.shape
    return pl.pallas_call(
        _pooler_kernel,
        out_shape=jax.ShapeDtypeStruct((B, Hb), jnp.float32),
    )(cls_bf16, w_pool_bf16, b_pool)


def fused_word_graph_pool_pallas(oh, bert_out, w_dense, b_dense,
                                 span_i8, key_padding, aspect_mask,
                                 wq, wk, wv, wo):
    B, Lw, Lb = oh.shape
    Hb = bert_out.shape[-1]
    H = w_dense.shape[-1]
    N = span_i8.shape[0]
    kpm3 = key_padding.reshape(B, 1, Lw)
    am3 = aspect_mask.reshape(B, 1, Lw)
    out = pl.pallas_call(
        _fused_word_graph_pool_kernel,
        out_shape=jax.ShapeDtypeStruct((B, 1, H), jnp.float32),
        grid=(B,),
        in_specs=[pl.BlockSpec((1, Lw, Lb), lambda b: (b, 0, 0)),      # one-hot (bf16)
                  pl.BlockSpec((1, Lb, Hb), lambda b: (b, 0, 0)),      # bert subtokens
                  pl.BlockSpec((Hb, H), lambda b: (0, 0)),             # w_dense (bf16)
                  pl.BlockSpec((1, H), lambda b: (0, 0)),              # b_dense (f32)
                  pl.BlockSpec((N, 1, Lw, Lw), lambda b: (0, b, 0, 0)),  # span (int8)
                  pl.BlockSpec((1, 1, Lw), lambda b: (b, 0, 0)),       # key padding
                  pl.BlockSpec((1, 1, Lw), lambda b: (b, 0, 0)),       # aspect mask
                  pl.BlockSpec((H, H), lambda b: (0, 0)),
                  pl.BlockSpec((H, H), lambda b: (0, 0)),
                  pl.BlockSpec((H, H), lambda b: (0, 0)),
                  pl.BlockSpec((H, H), lambda b: (0, 0))],
        out_specs=pl.BlockSpec((1, 1, H), lambda b: (b, 0, 0)),
        compiler_params=pltpu.CompilerParams(
            dimension_semantics=("parallel",)),
    )(oh, bert_out, w_dense, b_dense, span_i8, kpm3, am3, wq, wk, wv, wo)
    return out[:, 0, :]


# ----------------------------------------------------------------------------
# JAX glue (mask / span-matrix construction, embeddings, concat)
# ----------------------------------------------------------------------------

def sequence_mask(lengths, max_len=None):
    max_len = int(max_len) if max_len is not None else int(jnp.max(lengths))
    return jnp.arange(max_len, dtype=lengths.dtype)[None, :] >= lengths[:, None]


def get_span_matrix_4D(span_nbl):
    # span_nbl: [N, B, L] int  ->  [N, B, L, L]
    a = span_nbl[..., :, None]
    b = span_nbl[..., None, :]
    return a * (b == a).astype(span_nbl.dtype)


def intra_context_forward(params, inputs, con_dep_version="con_add_dep"):
    (length, bert_lengths, word_mapback, mask, bert_sequence,
     bert_segments_ids, adj, con_spans) = inputs

    # --- BERT stand-in: embeddings (glue) + Pallas mixing kernel ------------
    emb = (params["word_emb"][bert_sequence]
           + params["seg_emb"][bert_segments_ids]
           + params["pos_emb"][None, :, :]).astype(jnp.bfloat16)
    bert_out_full = bert_encoder_pallas(
        emb, params["w_enc"].astype(jnp.bfloat16))                      # [B,S,Hb] bf16
    bert_pooler_out = bert_pooler_pallas(
        bert_out_full[:, 0, :],
        params["w_pool"].astype(jnp.bfloat16), params["b_pool"])        # [B,Hb] f32
    # layer_drop: dropout is identity at inference.  # TODO(synk): training dropout

    max_bl = int(bert_lengths.max())
    # TODO(synk): assumes S >= max(bert_lengths)+1, as in the original slicing.
    bert_seq_indi = (~sequence_mask(bert_lengths, max_bl)
                     ).astype(jnp.bfloat16)[:, :, None]                 # [B,Lb,1]
    bert_out = bert_out_full[:, 1:max_bl + 1, :] * bert_seq_indi        # [B,Lb,Hb] bf16

    num_words = int(word_mapback.max()) + 1
    # TODO(synk): a scalar-prefetched gather/segment-sum would avoid the
    # one-hot matmul entirely; here we at least build it in bf16.
    oh = jax.nn.one_hot(word_mapback, num_words,
                        dtype=jnp.bfloat16) * bert_seq_indi             # [B,Lb,Lw]
    oh = jnp.transpose(oh, (0, 2, 1))                                   # [B,Lw,Lb]

    Lw = num_words
    key_padding = sequence_mask(length, Lw).astype(jnp.float32)         # [B,Lw]

    # span matrix construction (cheap elementwise glue)
    span4d = get_span_matrix_4D(jnp.transpose(con_spans, (1, 0, 2)))    # [N,B,Lw,Lw]
    if con_dep_version == "con_add_dep":
        span4d = (span4d + adj[None]) != 0
    elif con_dep_version == "wo_dep":
        pass
    elif con_dep_version == "wo_con":
        span4d = jnp.broadcast_to((adj != 0)[None], span4d.shape)
    elif con_dep_version == "con_dot_dep":
        span4d = (span4d * adj[None]) != 0
    span_i8 = (span4d != 0).astype(jnp.int8)                            # int8 mask

    combined = fused_word_graph_pool_pallas(
        oh, bert_out,
        params["w_dense"].astype(jnp.bfloat16), params["b_dense"],
        span_i8, key_padding, mask.astype(jnp.float32),
        params["wq"].astype(jnp.bfloat16), params["wk"].astype(jnp.bfloat16),
        params["wv"].astype(jnp.bfloat16), params["wo"].astype(jnp.bfloat16))

    return jnp.concatenate([combined, bert_pooler_out], axis=-1)        # [B, H+Hb]


# ----------------------------------------------------------------------------
# deterministic parameter init
# ----------------------------------------------------------------------------

def init_params(key, vocab, S, Hb, H, scale=0.05):
    ks = jax.random.split(key, 12)
    return {
        "word_emb": scale * jax.random.normal(ks[0], (vocab, Hb), jnp.float32),
        "seg_emb":  scale * jax.random.normal(ks[1], (2, Hb), jnp.float32),
        "pos_emb":  scale * jax.random.normal(ks[2], (S, Hb), jnp.float32),
        "w_enc":    scale * jax.random.normal(ks[3], (Hb, Hb), jnp.float32),
        "w_pool":   scale * jax.random.normal(ks[4], (Hb, Hb), jnp.float32),
        "b_pool":   jnp.zeros((1, Hb), jnp.float32),
        "w_dense":  scale * jax.random.normal(ks[5], (Hb, H), jnp.float32),
        "b_dense":  jnp.zeros((1, H), jnp.float32),
        "wq":       scale * jax.random.normal(ks[6], (H, H), jnp.float32),
        "wk":       scale * jax.random.normal(ks[7], (H, H), jnp.float32),
        "wv":       scale * jax.random.normal(ks[8], (H, H), jnp.float32),
        "wo":       scale * jax.random.normal(ks[9], (H, H), jnp.float32),
    }


if __name__ == "__main__":
    key = jax.random.PRNGKey(0)
    B, Lw, N, S, Hb, H = 2, 8, 2, 12, 32, 32
    vocab = 30
    Lb = 10

    params = init_params(key, vocab, S, Hb, H)

    k1, k2, k3 = jax.random.split(jax.random.PRNGKey(0), 3)
    length = jnp.array([8, 6], dtype=jnp.int32)                  # word lengths
    bert_lengths = jnp.array([10, 8], dtype=jnp.int32)           # subtoken lengths
    word_mapback = jnp.array([[0, 1, 2, 2, 3, 4, 5, 6, 7, 7],
                              [0, 1, 2, 3, 4, 5, 5, 0, 0, 0]], dtype=jnp.int32)
    mask = jnp.array([[0, 0, 1, 1, 0, 0, 0, 0],
                      [0, 1, 1, 0, 0, 0, 0, 0]], dtype=jnp.float32)   # aspect mask
    bert_sequence = jax.random.randint(k1, (B, S), 0, vocab, dtype=jnp.int32)
    bert_segments_ids = jnp.zeros((B, S), dtype=jnp.int32)
    adj = jax.random.bernoulli(k2, 0.3, (B, Lw, Lw)).astype(jnp.int32)
    con_spans = jax.random.randint(k3, (B, N, Lw), 0, 4, dtype=jnp.int32)

    inputs = (length, bert_lengths, word_mapback, mask, bert_sequence,
              bert_segments_ids, adj, con_spans)

    out = intra_context_forward(params, inputs, con_dep_version="con_add_dep")
    out = jax.block_until_ready(out)
    assert out.shape == (B, H + Hb), out.shape
    assert bool(jnp.all(jnp.isfinite(out)))
    print("KERNEL_OK")
</pallas_src>

<mosaic_0001>
module attributes {stable_mosaic.version = 11 : i64} {
  func.func @_bert_enc_kernel(%arg0: i32, %arg1: memref<1x12x32xbf16, #tpu.memory_space<vmem>>, %arg2: memref<32x32xbf16, #tpu.memory_space<vmem>>, %arg3: memref<1x12x32xbf16, #tpu.memory_space<vmem>>) attributes {dimension_semantics = [#tpu.dimension_semantics<parallel>], iteration_bounds = array<i64: 2>, scalar_prefetch = 0 : i64, scratch_operands = 0 : i64, tpu.core_type = #tpu.core_type<tc>, window_params = [{transform_indices = @transform_0, window_bounds = array<i64: 1, 12, 32>}, {pipeline_mode = #tpu.pipeline_mode<synchronous>, transform_indices = @transform_1, window_bounds = array<i64: 32, 32>}, {transform_indices = @transform_2, window_bounds = array<i64: 1, 12, 32>}]} {
    %c0 = arith.constant 0 : index
    %c0_0 = arith.constant 0 : index
    %c0_1 = arith.constant 0 : index
    %0 = vector.load %arg1[%c0, %c0_0, %c0_1] : memref<1x12x32xbf16, #tpu.memory_space<vmem>>, vector<1x12x32xbf16>
    %1 = vector.shape_cast %0 : vector<1x12x32xbf16> to vector<12x32xbf16>
    %c0_2 = arith.constant 0 : index
    %c0_3 = arith.constant 0 : index
    %2 = vector.load %arg2[%c0_2, %c0_3] : memref<32x32xbf16, #tpu.memory_space<vmem>>, vector<32x32xbf16>
    %cst = arith.constant dense<0.000000e+00> : vector<12x32xf32>
    %3 = tpu.matmul %1, %2, %cst {dimension_numbers = #tpu.dot_dimension_numbers<[1], [0], [0], [1], [0, 0, 1, 1], [], []>} : vector<12x32xbf16>, vector<32x32xbf16>, vector<12x32xf32> -> vector<12x32xf32>
    %4 = math.tanh %3 : vector<12x32xf32>
    %5 = arith.truncf %4 : vector<12x32xf32> to vector<12x32xbf16>
    %c0_4 = arith.constant 0 : index
    %c0_5 = arith.constant 0 : index
    %c0_6 = arith.constant 0 : index
    %6 = vector.load %arg3[%c0_4, %c0_5, %c0_6] : memref<1x12x32xbf16, #tpu.memory_space<vmem>>, vector<1x12x32xbf16>
    %7 = vector.shape_cast %6 : vector<1x12x32xbf16> to vector<12x32xbf16>
    %8 = vector.shape_cast %5 : vector<12x32xbf16> to vector<1x12x32xbf16>
    tpu.vector_store %arg3[%c0_4, %c0_5, %c0_6], %8 {strides = array<i32>} : memref<1x12x32xbf16, #tpu.memory_space<vmem>>, vector<1x12x32xbf16>,
    return
  }
  func.func @transform_0(%arg0: i32) -> (i32, i32, i32) {
    %c0_i32 = arith.constant 0 : i32
    %c0_i32_0 = arith.constant 0 : i32
    %c0_i32_1 = arith.constant 0 : i32
    return %arg0, %c0_i32, %c0_i32_0 : i32, i32, i32
  }
  func.func @transform_1(%arg0: i32) -> (i32, i32) {
    %c0_i32 = arith.constant 0 : i32
    %c0_i32_0 = arith.constant 0 : i32
    %c0_i32_1 = arith.constant 0 : i32
    return %c0_i32, %c0_i32_0 : i32, i32
  }
  func.func @transform_2(%arg0: i32) -> (i32, i32, i32) {
    %c0_i32 = arith.constant 0 : i32
    %c0_i32_0 = arith.constant 0 : i32
    %c0_i32_1 = arith.constant 0 : i32
    return %arg0, %c0_i32, %c0_i32_0 : i32, i32, i32
  }
}

</mosaic_0001>

<bundles_post_ra>
// kernel: tpu_custom_call.1
= control target key start
LH: loop header
LB: loop body
LE: loop exit
PB: predicated region body
PF: predicated region fallthrough
CT: control target
= control target key end

     0   :  { %s356_s9 = smov 0   ;;  %s379_s0 = inlined_call_operand.vmem [shape: bf16[2,12,32], index: 0, kind: input, shape index: {}]   ;;  %s380_s1 = inlined_call_operand.vmem [shape: bf16[32,32], index: 1, kind: input, shape index: {}]   ;;  %s381_s2 = inlined_call_operand.vmem [shape: bf16[2,12,32], index: 2, kind: output, shape index: {}]  }
   0x1 LB: > { %s282_s10 = sadd.s32 4294967295, %s337_s9   ;;  %p286_p0 = scmp.ge.s32.totalorder %s337_s9, 1  ;;  %s337_s9 = sphi %s356_s9, %s12_s9  }
   0x2   : > { %p112_p1 = scmp.lt.s32.totalorder %s337_s9, 3 }
   0x4   : > { %p113_p2 = pnand %p286_p0, %p112_p1 }
   0x5   : > { %v324_v0 = vld [vmem:[%s380_s1] sm:$0xff] (!%p113_p2)   ;;  %v339_v1 = vmov (!%p113_p2), 0.0   ;;  %v325_v2 = vld [vmem:[%s380_s1 + $0x8] sm:$0xff] (!%p113_p2)   ;;  %vm340_vm0 = vmmov (!%p113_p2), 0   ;;  %p134_p3 = scmp.lt.s32.totalorder (!%p113_p2), %s282_s10, 1  ;;  %vm168_vm1 = vcmask (!%p113_p2), 261120  }
   0x6   : > { %116 = sbr.rel (%p113_p2) target bundleno = 245 (0xf5), region = 28  ;;  %306 = vmatprep.subr.bf16.mxu0 (!%p113_p2), %v339_v1  ;;  %310 = vmatprep.mubr.msk.bf16.mxu0 (!%p113_p2), %vm340_vm0, %v339_v1  ;;  %vm223_vm2 = vcmask (!%p113_p2), 257024   ;;  %vm225_vm3 = vcmask (!%p113_p2), 254976  }
   0x7   : > { %307 = vmatpush3.bf16.msra.mxu0 (!%p113_p2), %v324_v0 }
   0x8   : > { %308 = vmatprep.subr.bf16.mxu0 (!%p113_p2), %v339_v1 }
   0xb   : > { %309 = vmatpush3.bf16.msra.mxu0 (!%p113_p2), %v325_v2 }
   0xd   : > { %s383_s10 = smov (!%p134_p3, %s282_s10), 1 }
   0xe   : > { %s299_s15 = sshll.u32 %s383_s10, 3 }
   0xf   : > { %s138_s18 = scalar_lea.vmem %s379_s0, %s299_s15  ;;  %s143_s21 = scalar_lea.vmem %s381_s2, %s299_s15 }
  0x10   : > { %v326_v3 = vld [vmem:[%s138_s18] sm:$0x3f]  }
  0x11   : > { %311 = vmatmul.mubr.msk.bf16.vlgmr.msra.gmra.mrb[0].mxu0 %vm168_vm1, %v326_v3 }
  0xe4   : > { %v206_v4 = vpop.f32.mrb[0].mxu0 }
  0xe5   : > { %327 = vtanh.f32 %v206_v4  ;;  %v312_v5 = vpop.f32.mrb[1].mxu0 }
  0xe6   : > { %v209_v6 = vpop.f32.mrb[2].mxu0 }
  0xe7   : > { %329 = vtanh.f32 %v209_v6  ;;  %v313_v7 = vpop.f32.mrb[3].mxu0 }
  0xef   : > { %v328_v8 = vpop.eup %327 }
  0xf0   : > { %v301_v9 = vpack.c.bf16 %v328_v8, %v328_v8 }
  0xf1   : > { %v330_v10 = vpop.eup %329 }
  0xf2   : > { %224 = vst.msk [vmem:[%s143_s21] sm:$0xf] %vm223_vm2, %v301_v9  ;;  %v302_v11 = vpack.c.bf16 %v330_v10, %v330_v10 }
  0xf4   : > { %226 = vst.msk [vmem:[%s143_s21 + $0x4] sm:$0x3] %vm225_vm3, %v302_v11 }
  0xf5 PF: > { %s12_s9 = sadd.s32 1, %s337_s9  }
  0xf6   : > { %p9_p4 = scmp.ge.s32.totalorder %s12_s9, 4  }
  0xf8   :  { %11 = sbr.rel (!%p9_p4) target bundleno = 1 (0x1), region = 58 }

</bundles_post_ra>
